<compile_context>
chip_gen: v7x
topology: tpu7x:2x2x1
jax: 0.10.0
libtpu: 0.0.40
codegen_flags: <defaults>
</compile_context>

<pallas_src>
import functools

import jax
import jax.numpy as jnp
from jax.experimental import pallas as pl
from jax.experimental.pallas import tpu as pltpu


def _round_up(n, m):
    return (n + m - 1) // m * m


def adapter_kernel(x_ref, wd_ref, bd_ref, wu_ref, bu_ref, o_ref):
    """Fused down-projection -> swish -> up-projection for one row tile."""
    x = x_ref[...]                                            # (TM, D)
    # Down-sampler: (TM, D) @ (D, H) in the compute dtype, f32 accumulation.
    z = jnp.dot(x.astype(wd_ref.dtype), wd_ref[...],
                preferred_element_type=jnp.float32)
    z = z + bd_ref[...]                                       # (TM, H) + (1, H), f32
    z = z * jax.nn.sigmoid(z)                                 # swish in f32 (EUP)
    # Up-sampler: (TM, H) @ (H, D), f32 accumulation.
    y = jnp.dot(z.astype(wu_ref.dtype), wu_ref[...],
                preferred_element_type=jnp.float32)
    y = y + bu_ref[...]                                       # (TM, D) + (1, D), f32
    o_ref[...] = y.astype(o_ref.dtype)


@functools.partial(
    jax.jit,
    static_argnames=("row_tile", "single_buffer_weights", "compute_dtype"))
def _adapter_forward_impl(x, w_down, b_down, w_up, b_up, *,
                          row_tile, single_buffer_weights, compute_dtype):
    orig_shape = x.shape
    d = orig_shape[-1]
    h = w_down.shape[1]
    x2 = x.reshape(-1, d)
    rows = x2.shape[0]

    # Row tile: multiple of 8 sublanes, never larger than the (padded) rows.
    tm = min(row_tile, _round_up(rows, 8))
    tm = _round_up(tm, 8)
    rows_p = _round_up(rows, tm)
    if rows_p != rows:
        x2 = jnp.pad(x2, ((0, rows_p - rows), (0, 0)))
    grid = (rows_p // tm,)

    # Weights in the (bf16) compute dtype, done once outside the kernel.
    wd = w_down.astype(compute_dtype)
    wu = w_up.astype(compute_dtype)
    bd2 = b_down.reshape(1, h).astype(jnp.float32)
    bu2 = b_up.reshape(1, d).astype(jnp.float32)

    # Explicit scoped-VMEM budget: weights (+biases) + double-buffered x/out
    # tiles + live f32 intermediates, 2x headroom, capped at 64 MiB (v7x).
    wbytes = jnp.finfo(compute_dtype).bits // 8
    xbytes = x2.dtype.itemsize
    wbuf = 1 if single_buffer_weights else 2
    est = (wbuf * ((d * h + h * d) * wbytes + (h + d) * 4)
           + 2 * tm * d * xbytes          # x tiles (double-buffered)
           + 2 * tm * d * xbytes          # out tiles (double-buffered)
           + tm * h * 4 + tm * d * 4)     # live f32 intermediates
    vmem_limit = int(min(max(2 * est, 8 * 1024 * 1024), 64 * 1024 * 1024))

    # Single-buffer the grid-invariant operands (index_map is (0,0) forever).
    wkw = {"pipeline_mode": pl.Buffered(1)} if single_buffer_weights else {}

    out = pl.pallas_call(
        adapter_kernel,
        out_shape=jax.ShapeDtypeStruct((rows_p, d), x.dtype),
        grid_spec=pltpu.PrefetchScalarGridSpec(
            num_scalar_prefetch=0,
            grid=grid,
            in_specs=[
                pl.BlockSpec((tm, d), lambda i: (i, 0)),         # x row tile
                pl.BlockSpec((d, h), lambda i: (0, 0), **wkw),   # W_down (in,out)
                pl.BlockSpec((1, h), lambda i: (0, 0), **wkw),   # b_down
                pl.BlockSpec((h, d), lambda i: (0, 0), **wkw),   # W_up (in,out)
                pl.BlockSpec((1, d), lambda i: (0, 0), **wkw),   # b_up
            ],
            out_specs=pl.BlockSpec((tm, d), lambda i: (i, 0)),
        ),
        compiler_params=pltpu.CompilerParams(
            dimension_semantics=("parallel",),
            vmem_limit_bytes=vmem_limit,
        ),
    )(x2, wd, bd2, wu, bu2)

    if rows_p != rows:
        out = out[:rows]
    return out.reshape(orig_shape)


def adapter_forward(x, w_down, b_down, w_up, b_up,
                    row_tile=256, compute_dtype=jnp.bfloat16):
    """x: (..., input_dim). Returns array of same shape/dtype as x."""
    kwargs = dict(row_tile=row_tile, compute_dtype=compute_dtype)
    try:
        return _adapter_forward_impl(x, w_down, b_down, w_up, b_up,
                                     single_buffer_weights=True, **kwargs)
    except Exception:
        # pipeline_mode=pl.Buffered(1) not accepted by this jax/Mosaic build:
        # fall back to default double-buffered invariant operands.
        return _adapter_forward_impl(x, w_down, b_down, w_up, b_up,
                                     single_buffer_weights=False, **kwargs)


def init_adapter_params(key, input_dim, reduction_factor, weight_init_range):
    """Deterministic parameter init mirroring linear_layer(..., std=...)."""
    down_size = input_dim // reduction_factor
    k1, k2 = jax.random.split(key)
    # Stored as (in_features, out_features) == transpose of PyTorch Linear weight.
    w_down = (jax.random.normal(k1, (input_dim, down_size), jnp.float32)
              * weight_init_range)
    b_down = jnp.zeros((down_size,), jnp.float32)
    w_up = (jax.random.normal(k2, (down_size, input_dim), jnp.float32)
            * weight_init_range)
    b_up = jnp.zeros((input_dim,), jnp.float32)
    return w_down, b_down, w_up, b_up


if __name__ == "__main__":
    # Small shapes implied by the module (token activations batch, seq, hidden).
    batch, seq, input_dim = 2, 9, 32          # rows = 18: exercises row padding
    reduction_factor = 4                      # down_sample_size = 8
    weight_init_range = 1e-2

    key = jax.random.PRNGKey(0)
    kx, kp = jax.random.split(key)

    x = jax.random.normal(kx, (batch, seq, input_dim), jnp.float32)
    w_down, b_down, w_up, b_up = init_adapter_params(
        kp, input_dim, reduction_factor, weight_init_range)

    # Default path (one padded row tile for this tiny demo).
    y = adapter_forward(x, w_down, b_down, w_up, b_up)
    y = jax.block_until_ready(y)
    # Multi-step grid path (row_tile=8 -> 3 grid steps, padded last tile).
    y_tiled = adapter_forward(x, w_down, b_down, w_up, b_up, row_tile=8)
    y_tiled = jax.block_until_ready(y_tiled)

    # Reference with the same numerics as the kernel (bf16 matmul, f32 accum).
    x2 = x.reshape(-1, input_dim)
    z = jnp.dot(x2.astype(jnp.bfloat16), w_down.astype(jnp.bfloat16),
                preferred_element_type=jnp.float32) + b_down
    z = z * jax.nn.sigmoid(z)
    y_ref = (jnp.dot(z.astype(jnp.bfloat16), w_up.astype(jnp.bfloat16),
                     preferred_element_type=jnp.float32) + b_up)
    y_ref = y_ref.astype(x.dtype).reshape(x.shape)

    # Full-f32 reference of the original module (loose check: bf16 error only).
    zf = x2 @ w_down + b_down
    zf = zf * jax.nn.sigmoid(zf)
    y_ref_f32 = (zf @ w_up + b_up).reshape(x.shape)

    assert y.shape == x.shape and y.dtype == x.dtype
    assert jnp.allclose(y, y_ref, atol=1e-5, rtol=1e-2), "mismatch vs bf16 reference"
    assert jnp.allclose(y_tiled, y_ref, atol=1e-5, rtol=1e-2), "tiled mismatch vs bf16 reference"
    assert jnp.allclose(y, y_ref_f32, atol=5e-4, rtol=5e-2), "mismatch vs f32 reference"

    print("KERNEL_OK")
</pallas_src>

<mosaic_0001>
module attributes {stable_mosaic.version = 11 : i64} {
  func.func @adapter_kernel(%arg0: i32, %arg1: memref<24x32xf32, #tpu.memory_space<vmem>>, %arg2: memref<32x8xbf16, #tpu.memory_space<vmem>>, %arg3: memref<1x8xf32, #tpu.memory_space<vmem>>, %arg4: memref<8x32xbf16, #tpu.memory_space<vmem>>, %arg5: memref<1x32xf32, #tpu.memory_space<vmem>>, %arg6: memref<24x32xf32, #tpu.memory_space<vmem>>) attributes {dimension_semantics = [#tpu.dimension_semantics<parallel>], iteration_bounds = array<i64: 1>, scalar_prefetch = 0 : i64, scratch_operands = 0 : i64, tpu.core_type = #tpu.core_type<tc>, window_params = [{transform_indices = @transform_0, window_bounds = array<i64: 24, 32>}, {pipeline_mode = #tpu.pipeline_mode<synchronous>, transform_indices = @transform_1, window_bounds = array<i64: 32, 8>}, {pipeline_mode = #tpu.pipeline_mode<synchronous>, transform_indices = @transform_2, window_bounds = array<i64: 1, 8>}, {pipeline_mode = #tpu.pipeline_mode<synchronous>, transform_indices = @transform_3, window_bounds = array<i64: 8, 32>}, {pipeline_mode = #tpu.pipeline_mode<synchronous>, transform_indices = @transform_4, window_bounds = array<i64: 1, 32>}, {transform_indices = @transform_5, window_bounds = array<i64: 24, 32>}]} {
    %c0 = arith.constant 0 : index
    %c0_0 = arith.constant 0 : index
    %0 = vector.load %arg1[%c0, %c0_0] : memref<24x32xf32, #tpu.memory_space<vmem>>, vector<24x32xf32>
    %1 = arith.truncf %0 : vector<24x32xf32> to vector<24x32xbf16>
    %c0_1 = arith.constant 0 : index
    %c0_2 = arith.constant 0 : index
    %2 = vector.load %arg2[%c0_1, %c0_2] : memref<32x8xbf16, #tpu.memory_space<vmem>>, vector<32x8xbf16>
    %cst = arith.constant dense<0.000000e+00> : vector<24x8xf32>
    %3 = tpu.matmul %1, %2, %cst {dimension_numbers = #tpu.dot_dimension_numbers<[1], [0], [0], [1], [0, 0, 1, 1], [], []>} : vector<24x32xbf16>, vector<32x8xbf16>, vector<24x8xf32> -> vector<24x8xf32>
    %c0_3 = arith.constant 0 : index
    %c0_4 = arith.constant 0 : index
    %4 = vector.load %arg3[%c0_3, %c0_4] : memref<1x8xf32, #tpu.memory_space<vmem>>, vector<1x8xf32>
    %5 = vector.broadcast %4 : vector<1x8xf32> to vector<24x8xf32>
    %6 = arith.addf %3, %5 : vector<24x8xf32>
    %7 = arith.negf %6 : vector<24x8xf32>
    %8 = math.exp %7 : vector<24x8xf32>
    %cst_5 = arith.constant 1.000000e+00 : f32
    %9 = vector.broadcast %cst_5 : f32 to vector<24x8xf32>
    %10 = arith.addf %9, %8 : vector<24x8xf32>
    %11 = arith.divf %9, %10 : vector<24x8xf32>
    %12 = arith.mulf %6, %11 : vector<24x8xf32>
    %13 = arith.truncf %12 : vector<24x8xf32> to vector<24x8xbf16>
    %c0_6 = arith.constant 0 : index
    %c0_7 = arith.constant 0 : index
    %14 = vector.load %arg4[%c0_6, %c0_7] : memref<8x32xbf16, #tpu.memory_space<vmem>>, vector<8x32xbf16>
    %cst_8 = arith.constant dense<0.000000e+00> : vector<24x32xf32>
    %15 = tpu.matmul %13, %14, %cst_8 {dimension_numbers = #tpu.dot_dimension_numbers<[1], [0], [0], [1], [0, 0, 1, 1], [], []>} : vector<24x8xbf16>, vector<8x32xbf16>, vector<24x32xf32> -> vector<24x32xf32>
    %c0_9 = arith.constant 0 : index
    %c0_10 = arith.constant 0 : index
    %16 = vector.load %arg5[%c0_9, %c0_10] : memref<1x32xf32, #tpu.memory_space<vmem>>, vector<1x32xf32>
    %17 = vector.broadcast %16 : vector<1x32xf32> to vector<24x32xf32>
    %18 = arith.addf %15, %17 : vector<24x32xf32>
    %c0_11 = arith.constant 0 : index
    %c0_12 = arith.constant 0 : index
    %19 = vector.load %arg6[%c0_11, %c0_12] : memref<24x32xf32, #tpu.memory_space<vmem>>, vector<24x32xf32>
    tpu.vector_store %arg6[%c0_11, %c0_12], %18 {strides = array<i32>} : memref<24x32xf32, #tpu.memory_space<vmem>>, vector<24x32xf32>,
    return
  }
  func.func @transform_0(%arg0: i32) -> (i32, i32) {
    %c0_i32 = arith.constant 0 : i32
    %c0_i32_0 = arith.constant 0 : i32
    return %arg0, %c0_i32 : i32, i32
  }
  func.func @transform_1(%arg0: i32) -> (i32, i32) {
    %c0_i32 = arith.constant 0 : i32
    %c0_i32_0 = arith.constant 0 : i32
    %c0_i32_1 = arith.constant 0 : i32
    return %c0_i32, %c0_i32_0 : i32, i32
  }
  func.func @transform_2(%arg0: i32) -> (i32, i32) {
    %c0_i32 = arith.constant 0 : i32
    %c0_i32_0 = arith.constant 0 : i32
    %c0_i32_1 = arith.constant 0 : i32
    return %c0_i32, %c0_i32_0 : i32, i32
  }
  func.func @transform_3(%arg0: i32) -> (i32, i32) {
    %c0_i32 = arith.constant 0 : i32
    %c0_i32_0 = arith.constant 0 : i32
    %c0_i32_1 = arith.constant 0 : i32
    return %c0_i32, %c0_i32_0 : i32, i32
  }
  func.func @transform_4(%arg0: i32) -> (i32, i32) {
    %c0_i32 = arith.constant 0 : i32
    %c0_i32_0 = arith.constant 0 : i32
    %c0_i32_1 = arith.constant 0 : i32
    return %c0_i32, %c0_i32_0 : i32, i32
  }
  func.func @transform_5(%arg0: i32) -> (i32, i32) {
    %c0_i32 = arith.constant 0 : i32
    %c0_i32_0 = arith.constant 0 : i32
    return %arg0, %c0_i32 : i32, i32
  }
}

module attributes {stable_mosaic.version = 11 : i64} {
  func.func @adapter_kernel(%arg0: i32, %arg1: memref<24x32xf32, #tpu.memory_space<vmem>>, %arg2: memref<32x8xbf16, #tpu.memory_space<vmem>>, %arg3: memref<1x8xf32, #tpu.memory_space<vmem>>, %arg4: memref<8x32xbf16, #tpu.memory_space<vmem>>, %arg5: memref<1x32xf32, #tpu.memory_space<vmem>>, %arg6: memref<24x32xf32, #tpu.memory_space<vmem>>) attributes {dimension_semantics = [#tpu.dimension_semantics<parallel>], iteration_bounds = array<i64: 1>, scalar_prefetch = 0 : i64, scratch_operands = 0 : i64, tpu.core_type = #tpu.core_type<tc>, window_params = [{transform_indices = @transform_0, window_bounds = array<i64: 24, 32>}, {pipeline_mode = #tpu.pipeline_mode<synchronous>, transform_indices = @transform_1, window_bounds = array<i64: 32, 8>}, {pipeline_mode = #tpu.pipeline_mode<synchronous>, transform_indices = @transform_2, window_bounds = array<i64: 1, 8>}, {pipeline_mode = #tpu.pipeline_mode<synchronous>, transform_indices = @transform_3, window_bounds = array<i64: 8, 32>}, {pipeline_mode = #tpu.pipeline_mode<synchronous>, transform_indices = @transform_4, window_bounds = array<i64: 1, 32>}, {transform_indices = @transform_5, window_bounds = array<i64: 24, 32>}]} {
    %c0 = arith.constant 0 : index
    %c0_0 = arith.constant 0 : index
    %0 = vector.load %arg1[%c0, %c0_0] : memref<24x32xf32, #tpu.memory_space<vmem>>, vector<24x32xf32>
    %1 = arith.truncf %0 : vector<24x32xf32> to vector<24x32xbf16>
    %c0_1 = arith.constant 0 : index
    %c0_2 = arith.constant 0 : index
    %2 = vector.load %arg2[%c0_1, %c0_2] : memref<32x8xbf16, #tpu.memory_space<vmem>>, vector<32x8xbf16>
    %cst = arith.constant dense<0.000000e+00> : vector<24x8xf32>
    %3 = tpu.matmul %1, %2, %cst {dimension_numbers = #tpu.dot_dimension_numbers<[1], [0], [0], [1], [0, 0, 1, 1], [], []>} : vector<24x32xbf16>, vector<32x8xbf16>, vector<24x8xf32> -> vector<24x8xf32>
    %c0_3 = arith.constant 0 : index
    %c0_4 = arith.constant 0 : index
    %4 = vector.load %arg3[%c0_3, %c0_4] : memref<1x8xf32, #tpu.memory_space<vmem>>, vector<1x8xf32>
    %5 = vector.broadcast %4 : vector<1x8xf32> to vector<24x8xf32>
    %6 = arith.addf %3, %5 : vector<24x8xf32>
    %7 = arith.negf %6 : vector<24x8xf32>
    %8 = math.exp %7 : vector<24x8xf32>
    %cst_5 = arith.constant 1.000000e+00 : f32
    %9 = vector.broadcast %cst_5 : f32 to vector<24x8xf32>
    %10 = arith.addf %9, %8 : vector<24x8xf32>
    %11 = arith.divf %9, %10 : vector<24x8xf32>
    %12 = arith.mulf %6, %11 : vector<24x8xf32>
    %13 = arith.truncf %12 : vector<24x8xf32> to vector<24x8xbf16>
    %c0_6 = arith.constant 0 : index
    %c0_7 = arith.constant 0 : index
    %14 = vector.load %arg4[%c0_6, %c0_7] : memref<8x32xbf16, #tpu.memory_space<vmem>>, vector<8x32xbf16>
    %cst_8 = arith.constant dense<0.000000e+00> : vector<24x32xf32>
    %15 = tpu.matmul %13, %14, %cst_8 {dimension_numbers = #tpu.dot_dimension_numbers<[1], [0], [0], [1], [0, 0, 1, 1], [], []>} : vector<24x8xbf16>, vector<8x32xbf16>, vector<24x32xf32> -> vector<24x32xf32>
    %c0_9 = arith.constant 0 : index
    %c0_10 = arith.constant 0 : index
    %16 = vector.load %arg5[%c0_9, %c0_10] : memref<1x32xf32, #tpu.memory_space<vmem>>, vector<1x32xf32>
    %17 = vector.broadcast %16 : vector<1x32xf32> to vector<24x32xf32>
    %18 = arith.addf %15, %17 : vector<24x32xf32>
    %c0_11 = arith.constant 0 : index
    %c0_12 = arith.constant 0 : index
    %19 = vector.load %arg6[%c0_11, %c0_12] : memref<24x32xf32, #tpu.memory_space<vmem>>, vector<24x32xf32>
    tpu.vector_store %arg6[%c0_11, %c0_12], %18 {strides = array<i32>} : memref<24x32xf32, #tpu.memory_space<vmem>>, vector<24x32xf32>,
    return
  }
  func.func @transform_0(%arg0: i32) -> (i32, i32) {
    %c0_i32 = arith.constant 0 : i32
    %c0_i32_0 = arith.constant 0 : i32
    return %arg0, %c0_i32 : i32, i32
  }
  func.func @transform_1(%arg0: i32) -> (i32, i32) {
    %c0_i32 = arith.constant 0 : i32
    %c0_i32_0 = arith.constant 0 : i32
    %c0_i32_1 = arith.constant 0 : i32
    return %c0_i32, %c0_i32_0 : i32, i32
  }
  func.func @transform_2(%arg0: i32) -> (i32, i32) {
    %c0_i32 = arith.constant 0 : i32
    %c0_i32_0 = arith.constant 0 : i32
    %c0_i32_1 = arith.constant 0 : i32
    return %c0_i32, %c0_i32_0 : i32, i32
  }
  func.func @transform_3(%arg0: i32) -> (i32, i32) {
    %c0_i32 = arith.constant 0 : i32
    %c0_i32_0 = arith.constant 0 : i32
    %c0_i32_1 = arith.constant 0 : i32
    return %c0_i32, %c0_i32_0 : i32, i32
  }
  func.func @transform_4(%arg0: i32) -> (i32, i32) {
    %c0_i32 = arith.constant 0 : i32
    %c0_i32_0 = arith.constant 0 : i32
    %c0_i32_1 = arith.constant 0 : i32
    return %c0_i32, %c0_i32_0 : i32, i32
  }
  func.func @transform_5(%arg0: i32) -> (i32, i32) {
    %c0_i32 = arith.constant 0 : i32
    %c0_i32_0 = arith.constant 0 : i32
    return %arg0, %c0_i32 : i32, i32
  }
}

</mosaic_0001>

<bundles_post_ra>
// kernel: _adapter_forward_impl.1
= control target key start
LH: loop header
LB: loop body
LE: loop exit
PB: predicated region body
PF: predicated region fallthrough
CT: control target
= control target key end

     0   :  { %vm49_vm0 = vcmask 261120   ;;  %vm142_vm1 = vcmask 1043456   ;;  %vm135_vm2 = vcmask 64512   ;;  %s316_s1 = inlined_call_operand.vmem [shape: bf16[32,8], index: 1, kind: input, shape index: {}]   ;;  %s317_s0 = inlined_call_operand.vmem [shape: f32[24,32], index: 0, kind: input, shape index: {}]   ;;  %s318_s3 = inlined_call_operand.vmem [shape: bf16[8,32], index: 3, kind: input, shape index: {}]   ;;  %s319_s2 = inlined_call_operand.vmem [shape: f32[1,8], index: 2, kind: input, shape index: {}]   ;;  %s320_s4 = inlined_call_operand.vmem [shape: f32[1,32], index: 4, kind: input, shape index: {}]   ;;  %s321_s5 = inlined_call_operand.vmem [shape: f32[24,32], index: 5, kind: output, shape index: {}]  }
   0x1   :  { %v234_v0 = vld [vmem:[%s316_s1] sm:$0xff]   ;;  %v235_v1 = vld [vmem:[%s316_s1 + $0x8] sm:$0xff]   ;;  %v23_v4 = vld [vmem:[%s317_s0 + $0x10] sm:$0xff] }
   0x2   :  { %219 = vmatprep.subr.bf16.mxu0 %v234_v0  ;;  %v21_v2 = vld [vmem:[%s317_s0] sm:$0xff]  ;;  %v22_v3 = vld [vmem:[%s317_s0 + $0x8] sm:$0xff]  ;;  %v25_v6 = vpack.c.bf16 %v23_v4, %v23_v4 }
   0x3   :  { %220 = vmatpush3.bf16.msra.mxu0 %v234_v0  ;;  %v24_v5 = vpack.c.bf16 %v22_v3, %v21_v2  ;;  %v127_v7 = vld [vmem:[%s318_s3] sm:$0xf] }
   0x4   :  { %221 = vmatprep.subr.bf16.mxu0 %v235_v1  ;;  %233 = vmatprep.subr.msk.bf16.mxu1 %vm142_vm1, %v127_v7  ;;  %v144_v8 = vsel %vm142_vm1, %v127_v7, 0  ;;  %v201_v9 = vld [vmem:[%s319_s2] ss:$0 sm:$0xff] }
   0x5   :  { %223 = vmatprep.mubr.msk.bf16.mxu0 %vm49_vm0, %v24_v5  ;;  %228 = vmatpush3.bf16.msra.mxu1 %v144_v8  ;;  %v209_v34 = vld [vmem:[%s320_s4] ss:$0 sm:$0xff] }
   0x7   :  { %222 = vmatpush3.bf16.msra.mxu0 %v235_v1 }
   0xa   :  { %224 = vmatmul.mubr.msk.bf16.vlgmr.msra.gmra.mrb[0].mxu0 %vm49_vm0, %v25_v6 }
  0xdd   :  { %v225_v10 = vpop.f32.mrb[0].mxu0 }
  0xde   :  { %v99_v11 = vadd.f32 %v225_v10, %v201_v9  ;;  %v90_v12 = vpop.f32.mrb[1].mxu0 }
  0xdf   :  { %v91_v13 = vadd.f32 %v201_v9, %v90_v12  ;;  %v226_v14 = vpop.f32.mrb[2].mxu0 }
  0xe0   :  { %v208_v15 = vmul.f32 -1.442695, %v99_v11  ;;  %v93_v16 = vpop.f32.mrb[3].mxu0 }
  0xe1   :  { %v206_v17 = vmul.f32 -1.442695, %v91_v13  ;;  %v94_v18 = vadd.f32 %v201_v9, %v93_v16 }
  0xe2   :  { %236 = vpow2.f32 %v208_v15 }
  0xe3   :  { %238 = vpow2.f32 %v206_v17  ;;  %v207_v19 = vmul.f32 -1.442695, %v94_v18 }
  0xe5   :  { %240 = vpow2.f32 %v207_v19 }
  0xec   :  { %v237_v20 = vpop.eup %236 }
  0xed   :  { %v239_v21 = vpop.eup %238  ;;  %v115_v22 = vadd.f32 1.0, %v237_v20 }
  0xee   :  { %v113_v23 = vadd.f32 1.0, %v239_v21 }
  0xef   :  { %v241_v24 = vpop.eup %240  ;;  %242 = vrcp.f32 %v115_v22 }
  0xf0   :  { %244 = vrcp.f32 %v113_v23  ;;  %v114_v25 = vadd.f32 1.0, %v241_v24 }
  0xf2   :  { %246 = vrcp.f32 %v114_v25 }
  0xf9   :  { %v243_v26 = vpop.eup %242 }
  0xfa   :  { %v245_v27 = vpop.eup %244  ;;  %v124_v29 = vmul.f32 %v243_v26, %v99_v11 }
  0xfb   :  { %v122_v30 = vmul.f32 %v245_v27, %v91_v13 }
  0xfc   :  { %v247_v28 = vpop.eup %246  ;;  %v126_v33 = vpack.c.bf16 %v124_v29, %v124_v29 }
  0xfd   :  { %v123_v31 = vmul.f32 %v247_v28, %v94_v18 }
  0xff   :  { %v125_v32 = vpack.c.bf16 %v123_v31, %v122_v30 }
 0x101   :  { %229 = vmatprep.mubr.msk.bf16.mxu1 %vm135_vm2, %v125_v32 }
 0x102   :  { %230 = vmatmul.mubr.msk.bf16.vlgmr.msra.gmra.mrb[0].mxu1 %vm135_vm2, %v126_v33 }
 0x1d5   :  { %v231_v35 = vpop.f32.mrb[0].mxu1 }
 0x1d6   :  { %v189_v36 = vadd.f32 %v231_v35, %v209_v34  ;;  %v180_v37 = vpop.f32.mrb[1].mxu1 }
 0x1d7   :  { %v181_v38 = vadd.f32 %v209_v34, %v180_v37  ;;  %v232_v39 = vpop.f32.mrb[2].mxu1 }
 0x1d8   :  { %196 = vst.msk [vmem:[%s321_s5 + $0x10] sm:$0xff] %vm49_vm0, %v189_v36  ;;  %v183_v40 = vpop.f32.mrb[3].mxu1 }
 0x1d9   :  { %194 = vst.msk [vmem:[%s321_s5] sm:$0xff] %vm49_vm0, %v181_v38  ;;  %v184_v41 = vadd.f32 %v209_v34, %v183_v40 }
 0x1db   :  { %195 = vst.msk [vmem:[%s321_s5 + $0x8] sm:$0xff] %vm49_vm0, %v184_v41 }

// kernel: _adapter_forward_impl.1
= control target key start
LH: loop header
LB: loop body
LE: loop exit
PB: predicated region body
PF: predicated region fallthrough
CT: control target
= control target key end

     0   :  { %vm49_vm0 = vcmask 261120   ;;  %vm142_vm1 = vcmask 1043456   ;;  %vm135_vm2 = vcmask 64512   ;;  %s316_s1 = inlined_call_operand.vmem [shape: bf16[32,8], index: 1, kind: input, shape index: {}]   ;;  %s317_s0 = inlined_call_operand.vmem [shape: f32[24,32], index: 0, kind: input, shape index: {}]   ;;  %s318_s3 = inlined_call_operand.vmem [shape: bf16[8,32], index: 3, kind: input, shape index: {}]   ;;  %s319_s2 = inlined_call_operand.vmem [shape: f32[1,8], index: 2, kind: input, shape index: {}]   ;;  %s320_s4 = inlined_call_operand.vmem [shape: f32[1,32], index: 4, kind: input, shape index: {}]   ;;  %s321_s5 = inlined_call_operand.vmem [shape: f32[24,32], index: 5, kind: output, shape index: {}]  }
   0x1   :  { %v234_v0 = vld [vmem:[%s316_s1] sm:$0xff]   ;;  %v235_v1 = vld [vmem:[%s316_s1 + $0x8] sm:$0xff]   ;;  %v23_v4 = vld [vmem:[%s317_s0 + $0x10] sm:$0xff] }
   0x2   :  { %219 = vmatprep.subr.bf16.mxu0 %v234_v0  ;;  %v21_v2 = vld [vmem:[%s317_s0] sm:$0xff]  ;;  %v22_v3 = vld [vmem:[%s317_s0 + $0x8] sm:$0xff]  ;;  %v25_v6 = vpack.c.bf16 %v23_v4, %v23_v4 }
   0x3   :  { %220 = vmatpush3.bf16.msra.mxu0 %v234_v0  ;;  %v24_v5 = vpack.c.bf16 %v22_v3, %v21_v2  ;;  %v127_v7 = vld [vmem:[%s318_s3] sm:$0xf] }
   0x4   :  { %221 = vmatprep.subr.bf16.mxu0 %v235_v1  ;;  %233 = vmatprep.subr.msk.bf16.mxu1 %vm142_vm1, %v127_v7  ;;  %v144_v8 = vsel %vm142_vm1, %v127_v7, 0  ;;  %v201_v9 = vld [vmem:[%s319_s2] ss:$0 sm:$0xff] }
   0x5   :  { %223 = vmatprep.mubr.msk.bf16.mxu0 %vm49_vm0, %v24_v5  ;;  %228 = vmatpush3.bf16.msra.mxu1 %v144_v8  ;;  %v209_v34 = vld [vmem:[%s320_s4] ss:$0 sm:$0xff] }
   0x7   :  { %222 = vmatpush3.bf16.msra.mxu0 %v235_v1 }
   0xa   :  { %224 = vmatmul.mubr.msk.bf16.vlgmr.msra.gmra.mrb[0].mxu0 %vm49_vm0, %v25_v6 }
  0xdd   :  { %v225_v10 = vpop.f32.mrb[0].mxu0 }
  0xde   :  { %v99_v11 = vadd.f32 %v225_v10, %v201_v9  ;;  %v90_v12 = vpop.f32.mrb[1].mxu0 }
  0xdf   :  { %v91_v13 = vadd.f32 %v201_v9, %v90_v12  ;;  %v226_v14 = vpop.f32.mrb[2].mxu0 }
  0xe0   :  { %v208_v15 = vmul.f32 -1.442695, %v99_v11  ;;  %v93_v16 = vpop.f32.mrb[3].mxu0 }
  0xe1   :  { %v206_v17 = vmul.f32 -1.442695, %v91_v13  ;;  %v94_v18 = vadd.f32 %v201_v9, %v93_v16 }
  0xe2   :  { %236 = vpow2.f32 %v208_v15 }
  0xe3   :  { %238 = vpow2.f32 %v206_v17  ;;  %v207_v19 = vmul.f32 -1.442695, %v94_v18 }
  0xe5   :  { %240 = vpow2.f32 %v207_v19 }
  0xec   :  { %v237_v20 = vpop.eup %236 }
  0xed   :  { %v239_v21 = vpop.eup %238  ;;  %v115_v22 = vadd.f32 1.0, %v237_v20 }
  0xee   :  { %v113_v23 = vadd.f32 1.0, %v239_v21 }
  0xef   :  { %v241_v24 = vpop.eup %240  ;;  %242 = vrcp.f32 %v115_v22 }
  0xf0   :  { %244 = vrcp.f32 %v113_v23  ;;  %v114_v25 = vadd.f32 1.0, %v241_v24 }
  0xf2   :  { %246 = vrcp.f32 %v114_v25 }
  0xf9   :  { %v243_v26 = vpop.eup %242 }
  0xfa   :  { %v245_v27 = vpop.eup %244  ;;  %v124_v29 = vmul.f32 %v243_v26, %v99_v11 }
  0xfb   :  { %v122_v30 = vmul.f32 %v245_v27, %v91_v13 }
  0xfc   :  { %v247_v28 = vpop.eup %246  ;;  %v126_v33 = vpack.c.bf16 %v124_v29, %v124_v29 }
  0xfd   :  { %v123_v31 = vmul.f32 %v247_v28, %v94_v18 }
  0xff   :  { %v125_v32 = vpack.c.bf16 %v123_v31, %v122_v30 }
 0x101   :  { %229 = vmatprep.mubr.msk.bf16.mxu1 %vm135_vm2, %v125_v32 }
 0x102   :  { %230 = vmatmul.mubr.msk.bf16.vlgmr.msra.gmra.mrb[0].mxu1 %vm135_vm2, %v126_v33 }
 0x1d5   :  { %v231_v35 = vpop.f32.mrb[0].mxu1 }
 0x1d6   :  { %v189_v36 = vadd.f32 %v231_v35, %v209_v34  ;;  %v180_v37 = vpop.f32.mrb[1].mxu1 }
 0x1d7   :  { %v181_v38 = vadd.f32 %v209_v34, %v180_v37  ;;  %v232_v39 = vpop.f32.mrb[2].mxu1 }
 0x1d8   :  { %196 = vst.msk [vmem:[%s321_s5 + $0x10] sm:$0xff] %vm49_vm0, %v189_v36  ;;  %v183_v40 = vpop.f32.mrb[3].mxu1 }
 0x1d9   :  { %194 = vst.msk [vmem:[%s321_s5] sm:$0xff] %vm49_vm0, %v181_v38  ;;  %v184_v41 = vadd.f32 %v209_v34, %v183_v40 }
 0x1db   :  { %195 = vst.msk [vmem:[%s321_s5 + $0x8] sm:$0xff] %vm49_vm0, %v184_v41 }

</bundles_post_ra>
